<compile_context>
chip_gen: v5e
topology: v5e:2x2
jax: 0.10.0
libtpu: 0.0.40
codegen_flags: <defaults>
</compile_context>

<pallas_src>
import functools
import math

import jax
import jax.numpy as jnp
from jax import lax
from jax.experimental import pallas as pl
from jax.experimental.pallas import tpu as pltpu

LANES = 128
WOFF = 8  # 8-aligned sublane offset of x1 inside the halo scratch of kernel 2


# --------------------------------------------------------------------------
# Kernel 1: conv1 (3x3, stride 1, pad 1, bias folded) + BN + ReLU, plus the
# per-channel sum over HW (feeds the global average pool).
# Input is the host-side kw-packed tensor xk (B, H+2, W, 3*Cin):
#   xk[b, h, w, kw*Cin + c] = xpad[b, h, w + kw, c]
# so each kh needs only a single K=3*Cin matmul per row chunk.
# --------------------------------------------------------------------------
def _conv1_kernel(xk_ref, w_ref, scale_ref, shift_ref, x1_ref, sum_ref,
                  *, H, W, rows_per_chunk):
    CP = x1_ref.shape[-1]
    K = w_ref.shape[1]
    colsum = jnp.zeros((1, CP), jnp.float32)
    r0 = 0
    while r0 < H:                                   # static Python chunk loop
        rows = min(rows_per_chunk, H - r0)
        hws = rows * W
        acc = jnp.zeros((hws, CP), jnp.float32)
        for kh in range(3):
            patch = xk_ref[0, r0 + kh:r0 + kh + rows, :, :].reshape(hws, K)
            acc = acc + jnp.dot(patch, w_ref[kh],
                                preferred_element_type=jnp.float32)
        acc = acc * scale_ref[...] + shift_ref[...]
        acc = jnp.maximum(acc, 0.0)
        colsum = colsum + jnp.sum(acc, axis=0, keepdims=True)
        x1_ref[0, r0 * W:r0 * W + hws, :] = acc.astype(x1_ref.dtype)
        r0 += rows
    sum_ref[0] = colsum


def conv1_fused(xk, w1p, scale, shift, *, H, W, CP, rows_per_chunk):
    B = xk.shape[0]
    Kp = w1p.shape[1]
    kernel = functools.partial(_conv1_kernel, H=H, W=W,
                               rows_per_chunk=rows_per_chunk)
    return pl.pallas_call(
        kernel,
        out_shape=(jax.ShapeDtypeStruct((B, H * W, CP), jnp.bfloat16),
                   jax.ShapeDtypeStruct((B, 1, CP), jnp.float32)),
        grid_spec=pltpu.PrefetchScalarGridSpec(
            num_scalar_prefetch=0,
            grid=(B,),
            in_specs=[
                pl.BlockSpec((1, H + 2, W, Kp), lambda b: (b, 0, 0, 0)),
                pl.BlockSpec((3, Kp, CP), lambda b: (0, 0, 0)),
                pl.BlockSpec((1, CP), lambda b: (0, 0)),
                pl.BlockSpec((1, CP), lambda b: (0, 0)),
            ],
            out_specs=(pl.BlockSpec((1, H * W, CP), lambda b: (b, 0, 0)),
                       pl.BlockSpec((1, 1, CP), lambda b: (b, 0, 0))),
        ),
        compiler_params=pltpu.CompilerParams(dimension_semantics=("parallel",)),
    )(xk, w1p, scale, shift)


# --------------------------------------------------------------------------
# Kernel 2: fused conv_dy + outer BN + ReLU.
#   out = relu( x1 @ W_b + bias_b + sc_b * conv3x3(x1, wd) )
# (all per-channel affines already folded into W_b / bias_b / sc_b).
# x1 is halo-padded inside the kernel via a zero-filled VMEM scratch; the data
# is placed at sublane offset WOFF (8-aligned) so the store is tile-aligned.
# --------------------------------------------------------------------------
def _dy_fused_kernel(x1_ref, wd_ref, wb_ref, bias_ref, sc_ref, o_ref, xp_ref,
                     *, H, W, rows_per_chunk):
    CP = o_ref.shape[-1]
    xp_ref[...] = jnp.zeros_like(xp_ref)
    xp_ref[1:H + 1, WOFF:WOFF + W, :] = x1_ref[0]
    bias = bias_ref[0]                                   # (1, CP) f32
    sc = sc_ref[0]                                       # (1, CP) f32
    r0 = 0
    while r0 < H:                                        # static chunk loop
        rows = min(rows_per_chunk, H - r0)
        hws = rows * W
        # dense dynamic branch: x1 @ W_b  (K = N = CP = 128)
        x1c = x1_ref[0, r0:r0 + rows, :, :].reshape(hws, CP)
        acc = jnp.dot(x1c, wb_ref[0], preferred_element_type=jnp.float32)
        acc = acc + bias
        # conv_dy.conv: 9 accumulating matmuls on shifted halo windows
        r = jnp.zeros((hws, CP), jnp.float32)
        for kh in range(3):
            for kw in range(3):
                patch = xp_ref[r0 + kh:r0 + kh + rows,
                               WOFF - 1 + kw:WOFF - 1 + kw + W, :]
                r = r + jnp.dot(patch.reshape(hws, CP), wd_ref[kh * 3 + kw],
                                preferred_element_type=jnp.float32)
        acc = acc + sc * r
        o_ref[0, r0 * W:r0 * W + hws, :] = jnp.maximum(acc, 0.0).astype(o_ref.dtype)
        r0 += rows


def dy_fused(x1_img, wd, wb, bias_b, sc_b, *, rows_per_chunk):
    B, H, W, CP = x1_img.shape
    kernel = functools.partial(_dy_fused_kernel, H=H, W=W,
                               rows_per_chunk=rows_per_chunk)
    return pl.pallas_call(
        kernel,
        out_shape=jax.ShapeDtypeStruct((B, H * W, CP), jnp.bfloat16),
        grid_spec=pltpu.PrefetchScalarGridSpec(
            num_scalar_prefetch=0,
            grid=(B,),
            in_specs=[
                pl.BlockSpec((1, H, W, CP), lambda b: (b, 0, 0, 0)),
                pl.BlockSpec((9, CP, CP), lambda b: (0, 0, 0)),
                pl.BlockSpec((1, CP, CP), lambda b: (b, 0, 0)),
                pl.BlockSpec((1, 1, CP), lambda b: (b, 0, 0)),
                pl.BlockSpec((1, 1, CP), lambda b: (b, 0, 0)),
            ],
            out_specs=pl.BlockSpec((1, H * W, CP), lambda b: (b, 0, 0)),
            scratch_shapes=[pltpu.VMEM((H + 2, W + 2 * WOFF, CP), jnp.bfloat16)],
        ),
        compiler_params=pltpu.CompilerParams(dimension_semantics=("parallel",)),
    )(x1_img, wd, wb, bias_b, sc_b)


# --------------------------------------------------------------------------
# Plain-JAX glue: weight layout transforms, BN folding, channel padding, params
# --------------------------------------------------------------------------
def conv3x3_to_9(w):  # torch (Cout, Cin, 3, 3) -> (9, Cin, Cout), k = kh*3+kw
    cout, cin = w.shape[0], w.shape[1]
    return jnp.transpose(w, (2, 3, 1, 0)).reshape(9, cin, cout)


def pad_axis(a, axis, size, value=0.0):
    cur = a.shape[axis]
    if cur == size:
        return a
    widths = [(0, 0)] * a.ndim
    widths[axis] = (0, size - cur)
    return jnp.pad(a, widths, constant_values=value)


def bn_fold(g, b, m, v, eps=1e-5):
    s = g / jnp.sqrt(v + eps)
    return s, b - m * s


def init_params(key, ch_in, ch_out):
    dim = int(math.sqrt(ch_out))
    sq = max(ch_out, dim * dim) // 16
    assert sq >= 1, "pick ch_out >= 16 so the squeeze dim is non-empty"
    keys = iter(jax.random.split(key, 32))

    def nrm(shape, std):
        return std * jax.random.normal(next(keys), shape, jnp.float32)

    def bn(n):
        g = 1.0 + 0.1 * jax.random.normal(next(keys), (n,), jnp.float32)
        b = 0.1 * jax.random.normal(next(keys), (n,), jnp.float32)
        m = 0.1 * jax.random.normal(next(keys), (n,), jnp.float32)
        v = 1.0 + 0.2 * jax.random.uniform(next(keys), (n,), jnp.float32)
        return (g, b, m, v)

    p = {}
    p["conv1_w"] = nrm((ch_out, ch_in, 3, 3), (2.0 / (ch_in * 9)) ** 0.5)
    p["conv1_b"] = nrm((ch_out,), 0.05)
    p["bn_a"] = bn(ch_out)
    p["dy_conv_w"] = nrm((ch_out, ch_out, 3, 3), (2.0 / (ch_out * 9)) ** 0.5)
    p["q_w"] = nrm((dim, ch_out, 1, 1), (2.0 / ch_out) ** 0.5)
    p["p_w"] = nrm((ch_out, dim, 1, 1), (2.0 / dim) ** 0.5)
    p["bn1"] = bn(dim)
    p["bn2"] = bn(dim)
    p["fc1_w"] = nrm((sq, ch_out), (1.0 / ch_out) ** 0.5)          # Linear(ch_out, sq)
    p["se_w"] = nrm((sq, sq), (1.0 / sq) ** 0.5)                    # Linear(sq, sq)
    p["phi_w"] = nrm((dim * dim, sq), (1.0 / sq) ** 0.5)            # Linear(sq, dim*dim)
    p["scale_w"] = nrm((ch_out, sq), (1.0 / sq) ** 0.5)             # Linear(sq, ch_out)
    p["bn_b"] = bn(ch_out)
    return p


# --------------------------------------------------------------------------
# conv_block forward (Pallas path).  Input/output: NCHW (PyTorch convention).
# --------------------------------------------------------------------------
def conv_block_forward(x_nchw, p, ch_out):
    dim = int(math.sqrt(ch_out))
    CP = ((ch_out + LANES - 1) // LANES) * LANES
    x = jnp.transpose(x_nchw, (0, 2, 3, 1)).astype(jnp.bfloat16)   # NHWC bf16
    B, H, W, Cin = x.shape
    HW = H * W
    rows_per_chunk = max(1, min(H, 128 // W)) if W <= 128 else 1
    hsig = lambda v: jnp.clip(v + 3.0, 0.0, 6.0) / 3.0             # relu6(x+3)/3

    # fold BN running stats; pre-fold conv1 bias into the shift
    s_a, t_a = bn_fold(*p["bn_a"])
    scale_a = pad_axis(s_a, 0, CP, 1.0).reshape(1, CP)
    shift_a = pad_axis(p["conv1_b"] * s_a + t_a, 0, CP, 0.0).reshape(1, CP)
    s1, t1 = bn_fold(*p["bn1"])
    s2, t2 = bn_fold(*p["bn2"])
    s3, t3 = bn_fold(*p["bn_b"])
    s3p = pad_axis(s3, 0, CP, 1.0)
    t3p = pad_axis(t3, 0, CP, 0.0)

    # ---- conv1: host-side kw-packing of the tiny ch_in input (+ row halo)
    xpad = jnp.pad(x, ((0, 0), (1, 1), (1, 1), (0, 0)))            # (B,H+2,W+2,Cin)
    xk = jnp.concatenate([xpad[:, :, kw:kw + W, :] for kw in range(3)],
                         axis=-1).astype(jnp.bfloat16)             # (B,H+2,W,3*Cin)
    # w1p[kh, kw*Cin + c, co] = conv1_w[co, c, kh, kw]
    w1p = jnp.transpose(p["conv1_w"], (2, 3, 1, 0)).reshape(3, 3 * Cin, ch_out)
    w1p = pad_axis(w1p, 2, CP).astype(jnp.bfloat16)

    x1, sums = conv1_fused(xk, w1p, scale_a, shift_a, H=H, W=W, CP=CP,
                           rows_per_chunk=rows_per_chunk)          # (B,HW,CP), (B,1,CP)

    # ---- batched scalar pre-pass: avg-pool -> fc -> SE -> phi / scale,
    #      and collapse q/bn1/phi/bn2/p (+ outer BN) into W_b / bias_b / sc_b.
    y = sums[:, 0, :ch_out] / float(HW)                            # (B, C) f32
    y1 = y @ p["fc1_w"].T
    y2 = y1 * hsig(y1 @ p["se_w"].T)
    phi = (y2 @ p["phi_w"].T).reshape(B, dim, dim)
    scale = hsig(y2 @ p["scale_w"].T)                              # (B, C)

    A = pad_axis(p["q_w"].reshape(dim, ch_out).T * s1[None, :], 0, CP)   # (CP, dim)
    pw = pad_axis(p["p_w"].reshape(ch_out, dim).T, 1, CP)                # (dim, CP)
    M = jnp.swapaxes(phi, 1, 2) * s2[None, None, :] + jnp.eye(dim)[None]  # (B,dim,dim)
    Mpw = jnp.einsum("bji,ic->bjc", M, pw)                               # (B,dim,CP)
    Wb = (jnp.einsum("cj,bjk->bck", A, Mpw) * s3p[None, None, :]
          ).astype(jnp.bfloat16)                                         # (B,CP,CP)
    bias_dyn = (jnp.einsum("j,bji->bi", t1, M) + t2[None, :]) @ pw       # (B,CP)
    bias_b = (bias_dyn * s3p[None, :] + t3p[None, :]).reshape(B, 1, CP)
    sc_b = (pad_axis(scale, 1, CP) * s3p[None, :]).reshape(B, 1, CP)

    # ---- fused dy-conv + dense dynamic branch + outer BN + ReLU
    wd = pad_axis(pad_axis(conv3x3_to_9(p["dy_conv_w"]), 2, CP), 1, CP
                  ).astype(jnp.bfloat16)                                 # (9,CP,CP)
    x1_img = x1.reshape(B, H, W, CP)
    out = dy_fused(x1_img, wd, Wb, bias_b, sc_b,
                   rows_per_chunk=rows_per_chunk)                        # (B,HW,CP) bf16

    out = out.reshape(B, H, W, CP)[..., :ch_out]
    return jnp.transpose(out, (0, 3, 1, 2)).astype(jnp.float32)          # NCHW f32


# --------------------------------------------------------------------------
# Pure-JAX f32 reference (independent path) used only to sanity-check kernels.
# --------------------------------------------------------------------------
def ref_forward(x_nchw, p, ch_out):
    dim = int(math.sqrt(ch_out))
    hsig = lambda v: jnp.clip(v + 3.0, 0.0, 6.0) / 3.0
    x = jnp.transpose(x_nchw, (0, 2, 3, 1)).astype(jnp.float32)

    def conv3x3(inp, w):
        return lax.conv_general_dilated(
            inp, jnp.transpose(w, (2, 3, 1, 0)), window_strides=(1, 1),
            padding=((1, 1), (1, 1)), dimension_numbers=("NHWC", "HWIO", "NHWC"))

    s_a, t_a = bn_fold(*p["bn_a"])
    x1 = jnp.maximum((conv3x3(x, p["conv1_w"]) + p["conv1_b"]) * s_a + t_a, 0.0)
    B, H, W, C = x1.shape
    r = conv3x3(x1, p["dy_conv_w"])
    y = jnp.mean(x1, axis=(1, 2))
    y1 = y @ p["fc1_w"].T
    y2 = y1 * hsig(y1 @ p["se_w"].T)
    phi = (y2 @ p["phi_w"].T).reshape(B, dim, dim)
    scale = hsig(y2 @ p["scale_w"].T)
    s1, t1 = bn_fold(*p["bn1"])
    qo = (x1 @ p["q_w"].reshape(dim, C).T) * s1 + t1
    z = jnp.einsum("bhwj,bij->bhwi", qo, phi)
    s2, t2 = bn_fold(*p["bn2"])
    z = z * s2 + t2 + qo
    pout = z @ p["p_w"].reshape(ch_out, dim).T
    out = pout + scale[:, None, None, :] * r
    s3, t3 = bn_fold(*p["bn_b"])
    out = jnp.maximum(out * s3 + t3, 0.0)
    return jnp.transpose(out, (0, 3, 1, 2))


if __name__ == "__main__":
    key = jax.random.PRNGKey(0)
    kx, kp = jax.random.split(key)
    B, ch_in, H, W = 2, 8, 16, 16
    ch_out = 64                      # dim = 8, squeeze = 4, channel pad -> 128
    x = jax.random.normal(kx, (B, ch_in, H, W), jnp.float32)
    params = init_params(kp, ch_in, ch_out)

    out = jax.block_until_ready(conv_block_forward(x, params, ch_out))

    ref = ref_forward(x, params, ch_out)
    assert out.shape == (B, ch_out, H, W)
    assert bool(jnp.isfinite(out).all())
    err = float(jnp.max(jnp.abs(out - ref)))
    # bf16 matmul operands / bf16 intermediates vs f32 reference
    tol = 5e-2 * max(1.0, float(jnp.max(jnp.abs(ref))))
    assert err < tol, f"max abs err {err} exceeds tol {tol}"
    print("KERNEL_OK")
</pallas_src>

<mosaic_0001>
module attributes {stable_mosaic.version = 11 : i64} {
  func.func @_conv1_kernel(%arg0: i32, %arg1: memref<1x18x16x24xbf16, #tpu.memory_space<vmem>>, %arg2: memref<3x24x128xbf16, #tpu.memory_space<vmem>>, %arg3: memref<1x128xf32, #tpu.memory_space<vmem>>, %arg4: memref<1x128xf32, #tpu.memory_space<vmem>>, %arg5: memref<1x256x128xbf16, #tpu.memory_space<vmem>>, %arg6: memref<1x1x128xf32, #tpu.memory_space<vmem>>) attributes {dimension_semantics = [#tpu.dimension_semantics<parallel>], iteration_bounds = array<i64: 2>, scalar_prefetch = 0 : i64, scratch_operands = 0 : i64, tpu.core_type = #tpu.core_type<tc>, window_params = [{transform_indices = @transform_0, window_bounds = array<i64: 1, 18, 16, 24>}, {pipeline_mode = #tpu.pipeline_mode<synchronous>, transform_indices = @transform_1, window_bounds = array<i64: 3, 24, 128>}, {pipeline_mode = #tpu.pipeline_mode<synchronous>, transform_indices = @transform_2, window_bounds = array<i64: 1, 128>}, {pipeline_mode = #tpu.pipeline_mode<synchronous>, transform_indices = @transform_3, window_bounds = array<i64: 1, 128>}, {transform_indices = @transform_4, window_bounds = array<i64: 1, 256, 128>}, {transform_indices = @transform_5, window_bounds = array<i64: 1, 1, 128>}]} {
    %cst = arith.constant 0.000000e+00 : f32
    %0 = vector.broadcast %cst : f32 to vector<1x128xf32>
    %cst_0 = arith.constant 0.000000e+00 : f32
    %1 = vector.broadcast %cst_0 : f32 to vector<128x128xf32>
    %c0 = arith.constant 0 : index
    %c0_1 = arith.constant 0 : index
    %c0_2 = arith.constant 0 : index
    %c0_3 = arith.constant 0 : index
    %2 = vector.load %arg1[%c0, %c0_1, %c0_2, %c0_3] : memref<1x18x16x24xbf16, #tpu.memory_space<vmem>>, vector<1x8x16x24xbf16>
    %3 = vector.shape_cast %2 : vector<1x8x16x24xbf16> to vector<8x16x24xbf16>
    %4 = vector.shape_cast %3 : vector<8x16x24xbf16> to vector<128x24xbf16>
    %c0_4 = arith.constant 0 : index
    %c0_5 = arith.constant 0 : index
    %c0_6 = arith.constant 0 : index
    %5 = vector.load %arg2[%c0_4, %c0_5, %c0_6] : memref<3x24x128xbf16, #tpu.memory_space<vmem>>, vector<1x24x128xbf16>
    %6 = vector.shape_cast %5 : vector<1x24x128xbf16> to vector<24x128xbf16>
    %cst_7 = arith.constant dense<0.000000e+00> : vector<128x128xf32>
    %7 = tpu.matmul %4, %6, %cst_7 {dimension_numbers = #tpu.dot_dimension_numbers<[1], [0], [0], [1], [0, 0, 1, 1], [], []>} : vector<128x24xbf16>, vector<24x128xbf16>, vector<128x128xf32> -> vector<128x128xf32>
    %8 = arith.addf %1, %7 : vector<128x128xf32>
    %c0_8 = arith.constant 0 : index
    %c1 = arith.constant 1 : index
    %c0_9 = arith.constant 0 : index
    %c0_10 = arith.constant 0 : index
    %9 = vector.load %arg1[%c0_8, %c1, %c0_9, %c0_10] : memref<1x18x16x24xbf16, #tpu.memory_space<vmem>>, vector<1x8x16x24xbf16>
    %10 = vector.shape_cast %9 : vector<1x8x16x24xbf16> to vector<8x16x24xbf16>
    %11 = vector.shape_cast %10 : vector<8x16x24xbf16> to vector<128x24xbf16>
    %c1_11 = arith.constant 1 : index
    %c0_12 = arith.constant 0 : index
    %c0_13 = arith.constant 0 : index
    %12 = vector.load %arg2[%c1_11, %c0_12, %c0_13] : memref<3x24x128xbf16, #tpu.memory_space<vmem>>, vector<1x24x128xbf16>
    %13 = vector.shape_cast %12 : vector<1x24x128xbf16> to vector<24x128xbf16>
    %cst_14 = arith.constant dense<0.000000e+00> : vector<128x128xf32>
    %14 = tpu.matmul %11, %13, %cst_14 {dimension_numbers = #tpu.dot_dimension_numbers<[1], [0], [0], [1], [0, 0, 1, 1], [], []>} : vector<128x24xbf16>, vector<24x128xbf16>, vector<128x128xf32> -> vector<128x128xf32>
    %15 = arith.addf %8, %14 : vector<128x128xf32>
    %c0_15 = arith.constant 0 : index
    %c2 = arith.constant 2 : index
    %c0_16 = arith.constant 0 : index
    %c0_17 = arith.constant 0 : index
    %16 = vector.load %arg1[%c0_15, %c2, %c0_16, %c0_17] : memref<1x18x16x24xbf16, #tpu.memory_space<vmem>>, vector<1x8x16x24xbf16>
    %17 = vector.shape_cast %16 : vector<1x8x16x24xbf16> to vector<8x16x24xbf16>
    %18 = vector.shape_cast %17 : vector<8x16x24xbf16> to vector<128x24xbf16>
    %c2_18 = arith.constant 2 : index
    %c0_19 = arith.constant 0 : index
    %c0_20 = arith.constant 0 : index
    %19 = vector.load %arg2[%c2_18, %c0_19, %c0_20] : memref<3x24x128xbf16, #tpu.memory_space<vmem>>, vector<1x24x128xbf16>
    %20 = vector.shape_cast %19 : vector<1x24x128xbf16> to vector<24x128xbf16>
    %cst_21 = arith.constant dense<0.000000e+00> : vector<128x128xf32>
    %21 = tpu.matmul %18, %20, %cst_21 {dimension_numbers = #tpu.dot_dimension_numbers<[1], [0], [0], [1], [0, 0, 1, 1], [], []>} : vector<128x24xbf16>, vector<24x128xbf16>, vector<128x128xf32> -> vector<128x128xf32>
    %22 = arith.addf %15, %21 : vector<128x128xf32>
    %c0_22 = arith.constant 0 : index
    %c0_23 = arith.constant 0 : index
    %23 = vector.load %arg3[%c0_22, %c0_23] : memref<1x128xf32, #tpu.memory_space<vmem>>, vector<1x128xf32>
    %24 = vector.broadcast %23 : vector<1x128xf32> to vector<128x128xf32>
    %25 = arith.mulf %22, %24 : vector<128x128xf32>
    %c0_24 = arith.constant 0 : index
    %c0_25 = arith.constant 0 : index
    %26 = vector.load %arg4[%c0_24, %c0_25] : memref<1x128xf32, #tpu.memory_space<vmem>>, vector<1x128xf32>
    %27 = vector.broadcast %26 : vector<1x128xf32> to vector<128x128xf32>
    %28 = arith.addf %25, %27 : vector<128x128xf32>
    %cst_26 = arith.constant 0.000000e+00 : f32
    %29 = vector.broadcast %cst_26 : f32 to vector<128x128xf32>
    %30 = arith.maximumf %28, %29 : vector<128x128xf32>
    %cst_27 = arith.constant dense<0.000000e+00> : vector<128xf32>
    %31 = vector.multi_reduction <add>, %30, %cst_27 [0] : vector<128x128xf32> to vector<128xf32>
    %32 = vector.shape_cast %31 : vector<128xf32> to vector<1x128xf32>
    %33 = arith.addf %0, %32 : vector<1x128xf32>
    %34 = arith.truncf %30 : vector<128x128xf32> to vector<128x128xbf16>
    %c0_28 = arith.constant 0 : index
    %c0_29 = arith.constant 0 : index
    %c0_30 = arith.constant 0 : index
    %35 = vector.load %arg5[%c0_28, %c0_29, %c0_30] : memref<1x256x128xbf16, #tpu.memory_space<vmem>>, vector<1x128x128xbf16>
    %36 = vector.shape_cast %35 : vector<1x128x128xbf16> to vector<128x128xbf16>
    %37 = vector.shape_cast %34 : vector<128x128xbf16> to vector<1x128x128xbf16>
    tpu.vector_store %arg5[%c0_28, %c0_29, %c0_30], %37 {strides = array<i32>} : memref<1x256x128xbf16, #tpu.memory_space<vmem>>, vector<1x128x128xbf16>,
    %cst_31 = arith.constant 0.000000e+00 : f32
    %38 = vector.broadcast %cst_31 : f32 to vector<128x128xf32>
    %c0_32 = arith.constant 0 : index
    %c8 = arith.constant 8 : index
    %c0_33 = arith.constant 0 : index
    %c0_34 = arith.constant 0 : index
    %39 = vector.load %arg1[%c0_32, %c8, %c0_33, %c0_34] : memref<1x18x16x24xbf16, #tpu.memory_space<vmem>>, vector<1x8x16x24xbf16>
    %40 = vector.shape_cast %39 : vector<1x8x16x24xbf16> to vector<8x16x24xbf16>
    %41 = vector.shape_cast %40 : vector<8x16x24xbf16> to vector<128x24xbf16>
    %c0_35 = arith.constant 0 : index
    %c0_36 = arith.constant 0 : index
    %c0_37 = arith.constant 0 : index
    %42 = vector.load %arg2[%c0_35, %c0_36, %c0_37] : memref<3x24x128xbf16, #tpu.memory_space<vmem>>, vector<1x24x128xbf16>
    %43 = vector.shape_cast %42 : vector<1x24x128xbf16> to vector<24x128xbf16>
    %cst_38 = arith.constant dense<0.000000e+00> : vector<128x128xf32>
    %44 = tpu.matmul %41, %43, %cst_38 {dimension_numbers = #tpu.dot_dimension_numbers<[1], [0], [0], [1], [0, 0, 1, 1], [], []>} : vector<128x24xbf16>, vector<24x128xbf16>, vector<128x128xf32> -> vector<128x128xf32>
    %45 = arith.addf %38, %44 : vector<128x128xf32>
    %c0_39 = arith.constant 0 : index
    %c9 = arith.constant 9 : index
    %c0_40 = arith.constant 0 : index
    %c0_41 = arith.constant 0 : index
    %46 = vector.load %arg1[%c0_39, %c9, %c0_40, %c0_41] : memref<1x18x16x24xbf16, #tpu.memory_space<vmem>>, vector<1x8x16x24xbf16>
    %47 = vector.shape_cast %46 : vector<1x8x16x24xbf16> to vector<8x16x24xbf16>
    %48 = vector.shape_cast %47 : vector<8x16x24xbf16> to vector<128x24xbf16>
    %c1_42 = arith.constant 1 : index
    %c0_43 = arith.constant 0 : index
    %c0_44 = arith.constant 0 : index
    %49 = vector.load %arg2[%c1_42, %c0_43, %c0_44] : memref<3x24x128xbf16, #tpu.memory_space<vmem>>, vector<1x24x128xbf16>
    %50 = vector.shape_cast %49 : vector<1x24x128xbf16> to vector<24x128xbf16>
    %cst_45 = arith.constant dense<0.000000e+00> : vector<128x128xf32>
    %51 = tpu.matmul %48, %50, %cst_45 {dimension_numbers = #tpu.dot_dimension_numbers<[1], [0], [0], [1], [0, 0, 1, 1], [], []>} : vector<128x24xbf16>, vector<24x128xbf16>, vector<128x128xf32> -> vector<128x128xf32>
    %52 = arith.addf %45, %51 : vector<128x128xf32>
    %c0_46 = arith.constant 0 : index
    %c10 = arith.constant 10 : index
    %c0_47 = arith.constant 0 : index
    %c0_48 = arith.constant 0 : index
    %53 = vector.load %arg1[%c0_46, %c10, %c0_47, %c0_48] : memref<1x18x16x24xbf16, #tpu.memory_space<vmem>>, vector<1x8x16x24xbf16>
    %54 = vector.shape_cast %53 : vector<1x8x16x24xbf16> to vector<8x16x24xbf16>
    %55 = vector.shape_cast %54 : vector<8x16x24xbf16> to vector<128x24xbf16>
    %c2_49 = arith.constant 2 : index
    %c0_50 = arith.constant 0 : index
    %c0_51 = arith.constant 0 : index
    %56 = vector.load %arg2[%c2_49, %c0_50, %c0_51] : memref<3x24x128xbf16, #tpu.memory_space<vmem>>, vector<1x24x128xbf16>
    %57 = vector.shape_cast %56 : vector<1x24x128xbf16> to vector<24x128xbf16>
    %cst_52 = arith.constant dense<0.000000e+00> : vector<128x128xf32>
    %58 = tpu.matmul %55, %57, %cst_52 {dimension_numbers = #tpu.dot_dimension_numbers<[1], [0], [0], [1], [0, 0, 1, 1], [], []>} : vector<128x24xbf16>, vector<24x128xbf16>, vector<128x128xf32> -> vector<128x128xf32>
    %59 = arith.addf %52, %58 : vector<128x128xf32>
    %c0_53 = arith.constant 0 : index
    %c0_54 = arith.constant 0 : index
    %60 = vector.load %arg3[%c0_53, %c0_54] : memref<1x128xf32, #tpu.memory_space<vmem>>, vector<1x128xf32>
    %61 = vector.broadcast %60 : vector<1x128xf32> to vector<128x128xf32>
    %62 = arith.mulf %59, %61 : vector<128x128xf32>
    %c0_55 = arith.constant 0 : index
    %c0_56 = arith.constant 0 : index
    %63 = vector.load %arg4[%c0_55, %c0_56] : memref<1x128xf32, #tpu.memory_space<vmem>>, vector<1x128xf32>
    %64 = vector.broadcast %63 : vector<1x128xf32> to vector<128x128xf32>
    %65 = arith.addf %62, %64 : vector<128x128xf32>
    %cst_57 = arith.constant 0.000000e+00 : f32
    %66 = vector.broadcast %cst_57 : f32 to vector<128x128xf32>
    %67 = arith.maximumf %65, %66 : vector<128x128xf32>
    %cst_58 = arith.constant dense<0.000000e+00> : vector<128xf32>
    %68 = vector.multi_reduction <add>, %67, %cst_58 [0] : vector<128x128xf32> to vector<128xf32>
    %69 = vector.shape_cast %68 : vector<128xf32> to vector<1x128xf32>
    %70 = arith.addf %33, %69 : vector<1x128xf32>
    %71 = arith.truncf %67 : vector<128x128xf32> to vector<128x128xbf16>
    %c0_59 = arith.constant 0 : index
    %c128 = arith.constant 128 : index
    %c0_60 = arith.constant 0 : index
    %72 = vector.load %arg5[%c0_59, %c128, %c0_60] : memref<1x256x128xbf16, #tpu.memory_space<vmem>>, vector<1x128x128xbf16>
    %73 = vector.shape_cast %72 : vector<1x128x128xbf16> to vector<128x128xbf16>
    %74 = vector.shape_cast %71 : vector<128x128xbf16> to vector<1x128x128xbf16>
    tpu.vector_store %arg5[%c0_59, %c128, %c0_60], %74 {strides = array<i32>} : memref<1x256x128xbf16, #tpu.memory_space<vmem>>, vector<1x128x128xbf16>,
    %c0_61 = arith.constant 0 : index
    %c0_62 = arith.constant 0 : index
    %c0_63 = arith.constant 0 : index
    %75 = vector.load %arg6[%c0_61, %c0_62, %c0_63] : memref<1x1x128xf32, #tpu.memory_space<vmem>>, vector<1x1x128xf32>
    %76 = vector.shape_cast %75 : vector<1x1x128xf32> to vector<1x128xf32>
    %77 = vector.shape_cast %70 : vector<1x128xf32> to vector<1x1x128xf32>
    tpu.vector_store %arg6[%c0_61, %c0_62, %c0_63], %77 {strides = array<i32>} : memref<1x1x128xf32, #tpu.memory_space<vmem>>, vector<1x1x128xf32>,
    return
  }
  func.func @transform_0(%arg0: i32) -> (i32, i32, i32, i32) {
    %c0_i32 = arith.constant 0 : i32
    %c0_i32_0 = arith.constant 0 : i32
    %c0_i32_1 = arith.constant 0 : i32
    %c0_i32_2 = arith.constant 0 : i32
    return %arg0, %c0_i32, %c0_i32_0, %c0_i32_1 : i32, i32, i32, i32
  }
  func.func @transform_1(%arg0: i32) -> (i32, i32, i32) {
    %c0_i32 = arith.constant 0 : i32
    %c0_i32_0 = arith.constant 0 : i32
    %c0_i32_1 = arith.constant 0 : i32
    %c0_i32_2 = arith.constant 0 : i32
    return %c0_i32, %c0_i32_0, %c0_i32_1 : i32, i32, i32
  }
  func.func @transform_2(%arg0: i32) -> (i32, i32) {
    %c0_i32 = arith.constant 0 : i32
    %c0_i32_0 = arith.constant 0 : i32
    %c0_i32_1 = arith.constant 0 : i32
    return %c0_i32, %c0_i32_0 : i32, i32
  }
  func.func @transform_3(%arg0: i32) -> (i32, i32) {
    %c0_i32 = arith.constant 0 : i32
    %c0_i32_0 = arith.constant 0 : i32
    %c0_i32_1 = arith.constant 0 : i32
    return %c0_i32, %c0_i32_0 : i32, i32
  }
  func.func @transform_4(%arg0: i32) -> (i32, i32, i32) {
    %c0_i32 = arith.constant 0 : i32
    %c0_i32_0 = arith.constant 0 : i32
    %c0_i32_1 = arith.constant 0 : i32
    return %arg0, %c0_i32, %c0_i32_0 : i32, i32, i32
  }
  func.func @transform_5(%arg0: i32) -> (i32, i32, i32) {
    %c0_i32 = arith.constant 0 : i32
    %c0_i32_0 = arith.constant 0 : i32
    %c0_i32_1 = arith.constant 0 : i32
    return %arg0, %c0_i32, %c0_i32_0 : i32, i32, i32
  }
}

</mosaic_0001>

<bundles_post_ra>
// kernel: tpu_custom_call.1
= control target key start
LH: loop header
LB: loop body
LE: loop exit
PB: predicated region body
PF: predicated region fallthrough
CT: control target
= control target key end

     0   :  { %s2805_s0 = inlined_call_operand.hbm [shape: bf16[2,18,16,24], index: 0, kind: input, shape index: {}]   ;;  %s2806_s1 = inlined_call_operand.hbm [shape: bf16[3,24,128], index: 1, kind: input, shape index: {}]   ;;  %s2807_s2 = inlined_call_operand.vmem [shape: f32[1,128], index: 2, kind: input, shape index: {}]   ;;  %s2808_s3 = inlined_call_operand.vmem [shape: f32[1,128], index: 3, kind: input, shape index: {}]   ;;  %s2809_s4 = inlined_call_operand.hbm [shape: bf16[2,256,128], index: 4, kind: output, shape index: {0}]   ;;  %s2810_s5 = inlined_call_operand.hbm [shape: f32[2,1,128], index: 5, kind: output, shape index: {1}]  }
   0x1   :  { %2813 = sst [smem:[#allocation14_spill]] %s2806_s1 }
   0x2   :  { %11 = vsyncpa [#allocation3], 0 }
   0x3   :  { %13 = vsyncpa [#allocation3 + $0x1], 0 }
   0x4   :  { %14 = vsyncpa [#allocation6], 0 }
   0x5   :  { %15 = vsyncpa [#allocation4], 0 }
   0x6   :  { %17 = vsyncpa [#allocation4 + $0x1], 0 }
   0x7   :  { %18 = vsyncpa [#allocation9], 0 }
   0x8   :  { %20 = vsyncpa [#allocation9 + $0x1], 0  ;;  %s2326_s18 = smov 0   ;;  %s2328_s19 = smov 0  }
   0x9   :  { %s2330_s20 = smov 0   ;;  %s2332_s21 = smov 0  }
   0xa LB: > { %s2347_s22 = sadd.s32 4294967295, %s2289_s21   ;;  %s1543_s23 = sadd.s32 4294967294, %s2289_s21   ;;  %s2289_s21 = sphi %s2332_s21, %s2826_s21   ;;  %s2285_s20 = sphi %s2330_s20, %s2825_s20   ;;  %s2281_s19 = sphi %s2328_s19, %s2824_s19   ;;  %s2277_s18 = sphi %s2326_s18, %s2823_s18  }
   0xb   : > { %p46_p0 = scmp.ne.s32.totalorder %s2281_s19, %s2277_s18  ;;  %p47_p1 = scmp.eq.s32.totalorder %s2347_s22, 0 }
   0xc   : > { %p133_p2 = scmp.eq.s32.totalorder %s2347_s22, 1  ;;  %p139_p3 = scmp.eq.s32.totalorder %s1543_s23, 1 }
   0xd   : > { %p2356_p4 = por %p47_p1, %p46_p0  ;;  %p1544_p5 = scmp.ge.s32.totalorder %s2289_s21, 1 }
   0xe   : > { %p2361_p6 = por %p139_p3, %p46_p0  ;;  %p172_p7 = scmp.lt.s32.totalorder %s2289_s21, 3 }
   0xf   : > { %s2816_s1 = sld [smem:[#allocation14_spill]]  ;;  %s2291_s30 = smov [#allocation5]  }
  0x10   : > { %p2369_p8 = pnand %p1544_p5, %p172_p7  ;;  %s185_s6 = sshll.u32 %s2291_s30, 4  ;;  %s186_s6 = int_to_ptr.vmem [resolvable:$true] %s185_s6 }
  0x11   : > { %s2379_s7 = sadd.s32 1, %s2289_s21   ;;  %s2811_s8 = smov 64  }
  0x12   : > { %p2067_p9 = pneg %p2369_p8  ;;  %s2812_s9 = smov 4  }
  0x13   : > { %s30_s10 = ssub.s32 %s2289_s21, %s2379_s7  ;;  %s33_s11 = sadd.s32 1, %s2285_s20 }
  0x14   : > { %p2068_p10 = pnand %p2067_p9, %p47_p1  ;;  %p31_p12 = scmp.eq.s32.totalorder %s30_s10, 0 }
  0x15   : > { %s183_s28 = sshll.u32 %s2816_s1, 4  ;;  %p40_p13 = scmp.ne.s32.totalorder %s2285_s20, %s2281_s19  ;;  %s184_s28 = int_to_ptr.hbm [resolvable:$true] %s183_s28 }
  0x16   : > { %2070 = dma.hbm_to_vmem [thread:$0]  (!%p2068_p10), %s184_s28, 576, %s186_s6, [#allocation6], %s2811_s8, %s2811_s8, %s2812_s9  }
  0x17   : > { %p41_p0 = scmp.eq.s32.totalorder %s2289_s21, 0  ;;  %p2083_p3 = scmp.lt.s32.totalorder %s2289_s21, 2 }
  0x18   : > { %s2392_s12 = scalar_select %p31_p12, %s2285_s20, %s33_s11  }
  0x19   : > { %p42_p5 = por %p41_p0, %p40_p13  ;;  %p2396_p7 = por %p133_p2, %p40_p13 }
  0x1a   : > { %s205_s14 = sand.u32 1, %s2285_s20   ;;  %s2055_s15 = smul.u32 144, %s2289_s21 }
  0x1b   : > { %s2054_s16 = smul.u32 144, %s205_s14  ;;  %p2405_p9 = pnand %p2083_p3, %p42_p5 }
  0x1c   : > { %s214_s26 = scalar_lea.hbm %s2805_s0, %s2055_s15  ;;  %s206_s10 = scalar_lea.sflag [#allocation3], %s205_s14 }
  0x1d   : > { %s215_s28 = sshll.u32 %s214_s26, 4  ;;  %s209_s30 = scalar_lea.vmem [#allocation2], %s2054_s16  ;;  %s216_s28 = int_to_ptr.hbm [resolvable:$true] %s215_s28 }
  0x1e   : > { %s217_s6 = sshll.u32 %s209_s30, 4  ;;  %s2157_s11 = sshra.s32 %s216_s28, 4  ;;  %s218_s6 = int_to_ptr.vmem [resolvable:$true] %s217_s6  ;;  %s2158_s11 = int_to_ptr.hbm [resolvable:$true] %s2157_s11 }
  0x1f   : > { %s2159_s8 = scalar_lea.hbm %s2158_s11, 144  ;;  %p2161_p10 = pneg %p2405_p9 }
  0x20   : > { %p2160_p2 = scmp.ne.s32.totalorder %s2158_s11, %s2159_s8  ;;  %s2164_s23 = scalar_lea.hbm %s2805_s0, 288 }
  0x21   : > { %p2165_p0 = scmp.lt.s32.totalorder %s2158_s11, %s2805_s0  ;;  %p2166_p3 = scmp.lt.s32.totalorder %s2164_s23, %s2159_s8 }
  0x22   : > { %p2162_p12 = pnand %p2161_p10, %p2160_p2 }
  0x23   : > { %p2167_p5 = por %p2166_p3, %p2165_p0 }
  0x24   : > { %p2163_p13 = pneg %p2162_p12 }
  0x26   : > { %p2168_p11 = pnand %p2167_p5, %p2163_p13 }
  0x28   : > { %2171 = shalt.err (!%p2168_p11)
}
  0x29   : > { %s2820_s14 = smov 4   ;;  %s2821_s16 = smov 64  }
  0x2a   : > { %2074 = dma.hbm_to_vmem [thread:$0]  (!%p2405_p9), %s216_s28, 2304, %s218_s6, %s206_s10, %s2821_s16, %s2821_s16, %s2820_s14  }
  0x2b   : > { %229 = sbr.rel (%p2369_p8) target bundleno = 413 (0x19d), region = 36  ;;  %s2425_s26 = sand.u32 (!%p2369_p8), 1, %s2281_s19  }
  0x2c   : > { %s2056_s1 = smul.u32 (!%p2369_p8), 144, %s2425_s26  ;;  %s232_s8 = scalar_lea.sflag (!%p2369_p8), [#allocation3], %s2425_s26 }
  0x2e   : > { %s2429_s9 = scalar_lea.vmem (!%p2369_p8), [#allocation2], %s2056_s1 }
  0x30   : > { %2260 = dma.done.wait (%p2356_p4), %s232_s8, 2304  }
  0x31   : > { %2262 = vsyncadd (%p2356_p4), %s232_s8, 4294964992 }
  0x32   : > { %2264 = dma.done.wait (%p47_p1), [#allocation6], 576  }
  0x33   : > { %2266 = vsyncadd (%p47_p1), [#allocation6], 4294966720  ;;  %v312_v0 = vld [vmem:[#allocation5 + $0x14] sm:$0xf]  ;;  %v291_v1 = vld [vmem:[#allocation5 + $0x8] sm:$0xf] }
  0x34   : > { %v358_v2 = vunpack.c.l.b16 %v312_v0  ;;  %v485_v3 = vunpack.c.l.b16 %v291_v1  ;;  %vm387_vm0 = vcmask 1043456   ;;  %v876_v4 = vld [vmem:[#allocation5 + $0x14] sm:$0xf]  ;;  %v585_v8 = vld [vmem:[#allocation5 + $0x20] sm:$0xf]  ;;  %v1917_v16 = vld [vmem:[#allocation5 + $0xc] sm:$0xff] }
  0x35   : > { %v922_v7 = vunpack.c.l.b16 %v876_v4  ;;  %v856_v9 = vld [vmem:[#allocation5 + $0x8] sm:$0xf]  ;;  %v1146_v10 = vld [vmem:[#allocation5 + $0x20] sm:$0xf]  ;;  %v631_v11 = vunpack.c.l.b16 %v585_v8  ;;  %vm362_vm1 = vcmask 195584   ;;  %v1944_v30 = vld [vmem:[#allocation5 + $0xc] sm:$0xff] }
  0x36   : > { %v360_v5 = vpack.c.b16 %v358_v2, %v358_v2  ;;  %v487_v6 = vpack.c.b16 %v485_v3, %v485_v3  ;;  %v1047_v12 = vunpack.c.l.b16 %v856_v9  ;;  %v1192_v13 = vunpack.c.l.b16 %v1146_v10  ;;  %v1908_v19 = vld [vmem:[#allocation5] sm:$0xff]  ;;  %v1909_v22 = vld [vmem:[%s2429_s9 + $0x8] sm:$0xff]  ;;  %v1911_v38 = vld [vmem:[%s2429_s9 + $0x18] sm:$0xff]  ;;  %s1550_s15 = sshll.u32 %s2425_s26, 7  ;;  %s1954_s23 = sshll.u32 %s2347_s22, 7 }
  0x37   : > { %v924_v17 = vpack.c.b16 %v922_v7, %v922_v7  ;;  %v633_v18 = vpack.c.b16 %v631_v11, %v631_v11  ;;  %v1913_v23 = vld [vmem:[%s2429_s9 + $0x28] sm:$0xff]  ;;  %v1900_v26 = vld [vmem:[%s2429_s9] sm:$0xff]  ;;  %v1910_v34 = vld [vmem:[%s2429_s9 + $0x10] sm:$0xff]  ;;  %s2614_s17 = scalar_lea.vmem [#allocation7], %s1550_s15  ;;  %s1415_s1 = scalar_lea.hbm %s2809_s4, %s1954_s23 }
  0x38   : > { %v389_v14 = vsel %vm387_vm0, %v360_v5, 0  ;;  %v514_v15 = vsel %vm387_vm0, %v487_v6, 0  ;;  %v1049_v20 = vpack.c.b16 %v1047_v12, %v1047_v12  ;;  %v1194_v21 = vpack.c.b16 %v1192_v13, %v1192_v13  ;;  %v1904_v27 = vld [vmem:[%s2429_s9 + $0x20] sm:$0xff]  ;;  %v1926_v31 = vld [vmem:[#allocation5 + $0x18] sm:$0xff]  ;;  %v1914_v35 = vld [vmem:[%s2429_s9 + $0x30] sm:$0xff]  ;;  %s1416_s8 = sshll.u32 %s2614_s17, 4  ;;  %s1417_s8 = int_to_ptr.vmem [resolvable:$true] %s1416_s8 }
  0x39   : > { %397 = vmatpush.bf16.msra.mxu0 %v389_v14  ;;  %2050 = vmatpush.bf16.msra.mxu2 %v389_v14  ;;  %v951_v24 = vsel %vm387_vm0, %v924_v17, 0  ;;  %v660_v25 = vsel %vm387_vm0, %v633_v18, 0  ;;  %v1935_v32 = vld [vmem:[#allocation5] sm:$0xff]  ;;  %v1953_v33 = vld [vmem:[#allocation5 + $0x18] sm:$0xff]  ;;  %s1400_s24 = scalar_lea.sflag [#allocation4], %s2425_s26  ;;  %s2207_s6 = scalar_lea.hbm %s2809_s4, 256 }
  0x3a   : > { %522 = vmatpush.bf16.msra.mxu1 %v514_v15  ;;  %2052 = vmatpush.bf16.msra.mxu3 %v514_v15  ;;  %v1076_v28 = vsel %vm387_vm0, %v1049_v20, 0  ;;  %v1221_v29 = vsel %vm387_vm0, %v1194_v21, 0  ;;  %v1901_v36 = vld [vmem:[%s2429_s9 + $0x8] sm:$0xff]  ;;  %v1915_v39 = vld [vmem:[%s2429_s9 + $0x38] sm:$0xff]  ;;  %v1902_v40 = vld [vmem:[%s2429_s9 + $0x10] sm:$0xff] }
  0x3b   : > { %v1905_v37 = vld [vmem:[%s2429_s9 + $0x28] sm:$0xff]  ;;  %v1906_v41 = vld [vmem:[%s2429_s9 + $0x30] sm:$0xff]  ;;  %v1912_v42 = vld [vmem:[%s2429_s9 + $0x20] sm:$0xff] }
  0x3c   : > { %v1916_v43 = vld [vmem:[%s2429_s9 + $0x40] sm:$0xff]  ;;  %v1903_v44 = vld [vmem:[%s2429_s9 + $0x18] sm:$0xff]  ;;  %v1918_v46 = vld [vmem:[%s2429_s9 + $0x10] sm:$0xff] }
  0x3d   : > { %398 = vmatpush.bf16.msra.mxu0 %v1917_v16  ;;  %2051 = vmatpush.bf16.msra.mxu2 %v1917_v16  ;;  %v1907_v45 = vld [vmem:[%s2429_s9 + $0x38] sm:$0xff]  ;;  %v1927_v47 = vld [vmem:[%s2429_s9 + $0x40] sm:$0xff]  ;;  %v1936_v48 = vld [vmem:[%s2429_s9 + $0x48] sm:$0xff] }
  0x3e   : > { %523 = vmatpush.bf16.msra.mxu1 %v1908_v19  ;;  %2053 = vmatpush.bf16.msra.mxu3 %v1908_v19  ;;  %v1945_v49 = vld [vmem:[%s2429_s9 + $0x50] sm:$0xff]  ;;  %v1919_v50 = vld [vmem:[%s2429_s9 + $0x18] sm:$0xff]  ;;  %v1928_v51 = vld [vmem:[%s2429_s9 + $0x48] sm:$0xff] }
  0x3f   : > { %v1937_v52 = vld [vmem:[%s2429_s9 + $0x50] sm:$0xff]  ;;  %v1946_v53 = vld [vmem:[%s2429_s9 + $0x58] sm:$0xff]  ;;  %v1920_v54 = vld [vmem:[%s2429_s9 + $0x20] sm:$0xff] }
  0x40   : > { %1603 = vmatmul.msk.bf16.vlgmr.msra.gmra.mxu0 %vm362_vm1, %v1909_v22  ;;  %1607 = vmatmul.msk.bf16.vlgmr.msra.gmra.mxu2 %vm362_vm1, %v1913_v23  ;;  %v1929_v55 = vld [vmem:[%s2429_s9 + $0x50] sm:$0xff]  ;;  %v1938_v56 = vld [vmem:[%s2429_s9 + $0x58] sm:$0xff]  ;;  %v1947_v57 = vld [vmem:[%s2429_s9 + $0x60] sm:$0xff] }
  0x41   : > { %668 = vmatpush.bf16.msrb.mxu2 %v660_v25  ;;  %1647 = vmatmul.msk.bf16.vlgmr.msra.gmra.mxu1 %vm362_vm1, %v1900_v26  ;;  %v1921_v58 = vld [vmem:[%s2429_s9 + $0x28] sm:$0xff]  ;;  %v1930_v59 = vld [vmem:[%s2429_s9 + $0x58] sm:$0xff]  ;;  %v1939_v60 = vld [vmem:[%s2429_s9 + $0x60] sm:$0xff] }
  0x42   : > { %959 = vmatpush.bf16.msrb.mxu3 %v951_v24  ;;  %1084 = vmatpush.bf16.msrb.mxu0 %v1076_v28  ;;  %v1948_v61 = vld [vmem:[%s2429_s9 + $0x68] sm:$0xff]  ;;  %v1922_v62 = vld [vmem:[%s2429_s9 + $0x30] sm:$0xff]  ;;  %v1931_v63 = vld [vmem:[%s2429_s9 + $0x60] sm:$0xff] }
  0x43   : > { %1651 = vmatmul.msk.bf16.vlgmr.msra.gmra.mxu3 %vm362_vm1, %v1904_v27  ;;  %1229 = vmatpush.bf16.msrb.mxu1 %v1221_v29  ;;  %v1940_v1 = vld [vmem:[%s2429_s9 + $0x68] sm:$0xff]  ;;  %v1949_v2 = vld [vmem:[%s2429_s9 + $0x70] sm:$0xff]  ;;  %v1923_v12 = vld [vmem:[%s2429_s9 + $0x38] sm:$0xff] }
  0x44   : > { %v1932_v13 = vld [vmem:[%s2429_s9 + $0x68] sm:$0xff]  ;;  %v1941_v16 = vld [vmem:[%s2429_s9 + $0x70] sm:$0xff]  ;;  %v1950_v17 = vld [vmem:[%s2429_s9 + $0x78] sm:$0xff] }
  0x45   : > { %669 = vmatpush.bf16.msrb.mxu2 %v1926_v31  ;;  %v1924_v27 = vld [vmem:[%s2429_s9 + $0x40] sm:$0xff]  ;;  %v1933_v28 = vld [vmem:[%s2429_s9 + $0x70] sm:$0xff]  ;;  %v1942_v31 = vld [vmem:[%s2429_s9 + $0x78] sm:$0xff] }
  0x46   : > { %960 = vmatpush.bf16.msrb.mxu3 %v1944_v30  ;;  %1085 = vmatpush.bf16.msrb.mxu0 %v1935_v32  ;;  %v1951_v32 = vld [vmem:[%s2429_s9 + $0x80] sm:$0xff] }
  0x47   : > { %1230 = vmatpush.bf16.msrb.mxu1 %v1953_v33 }
  0x50   : > { %1604 = vmatmul.msk.bf16.gmra.mxu0 %vm362_vm1, %v1910_v34  ;;  %1608 = vmatmul.msk.bf16.gmra.mxu2 %vm362_vm1, %v1914_v35 }
  0x51   : > { %1648 = vmatmul.msk.bf16.gmra.mxu1 %vm362_vm1, %v1901_v36 }
  0x53   : > { %1652 = vmatmul.msk.bf16.gmra.mxu3 %vm362_vm1, %v1905_v37 }
  0x60   : > { %1605 = vmatmul.msk.bf16.gmra.mxu0 %vm362_vm1, %v1911_v38  ;;  %1609 = vmatmul.msk.bf16.gmra.mxu2 %vm362_vm1, %v1915_v39 }
  0x61   : > { %1649 = vmatmul.msk.bf16.gmra.mxu1 %vm362_vm1, %v1902_v40 }
  0x63   : > { %1653 = vmatmul.msk.bf16.gmra.mxu3 %vm362_vm1, %v1906_v41 }
  0x70   : > { %1606 = vmatmul.msk.bf16.gmra.mxu0 %vm362_vm1, %v1912_v42  ;;  %1610 = vmatmul.msk.bf16.gmra.mxu2 %vm362_vm1, %v1916_v43  ;;  %v1925_v42 = vld [vmem:[%s2429_s9 + $0x48] sm:$0xff]  ;;  %v1934_v43 = vld [vmem:[%s2429_s9 + $0x78] sm:$0xff] }
  0x71   : > { %1650 = vmatmul.msk.bf16.gmra.mxu1 %vm362_vm1, %v1903_v44 }
  0x73   : > { %1654 = vmatmul.msk.bf16.gmra.mxu3 %vm362_vm1, %v1907_v45 }
  0x80   : > { %1707 = vmatmul.msk.bf16.vlgmr.msrb.gmra.mxu2 %vm362_vm1, %v1918_v46  ;;  %1827 = vmatmul.msk.bf16.vlgmr.msrb.gmra.mxu0 %vm362_vm1, %v1927_v47  ;;  %v1943_v46 = vld [vmem:[%s2429_s9 + $0x80] sm:$0xff]  ;;  %v1952_v47 = vld [vmem:[%s2429_s9 + $0x88] sm:$0xff]  ;;  %s1418_s9 = sshll.u32 %s1415_s1, 4  ;;  %s1419_s9 = int_to_ptr.hbm [resolvable:$true] %s1418_s9 }
  0x81   : > { %1887 = vmatmul.msk.bf16.vlgmr.msrb.gmra.mxu1 %vm362_vm1, %v1945_v49  ;;  %s2201_s29 = sshra.s32 %s1419_s9, 4  ;;  %s2202_s29 = int_to_ptr.hbm [resolvable:$true] %s2201_s29 }
  0x82   : > { %s2203_s27 = scalar_lea.hbm %s2202_s29, 128  ;;  %p2208_p11 = scmp.lt.s32.totalorder %s2202_s29, %s2809_s4 }
  0x83   : > { %1783 = vmatmul.msk.bf16.vlgmr.msrb.gmra.mxu3 %vm362_vm1, %v1936_v48  ;;  %p2204_p1 = scmp.ne.s32.totalorder %s2202_s29, %s2203_s27  ;;  %p2209_p9 = scmp.lt.s32.totalorder %s2207_s6, %s2203_s27 }
  0x85   : > { %p2205_p4 = pnand %p2204_p1, %p2396_p7  ;;  %p2210_p2 = por %p2209_p9, %p2208_p11 }
  0x87   : > { %p2206_p8 = pneg %p2205_p4 }
  0x89   : > { %p2211_p10 = pnand %p2210_p2, %p2206_p8 }
  0x90   : > { %1708 = vmatmul.msk.bf16.gmra.mxu2 %vm362_vm1, %v1919_v50  ;;  %1828 = vmatmul.msk.bf16.gmra.mxu0 %vm362_vm1, %v1928_v51 }
  0x91   : > { %1888 = vmatmul.msk.bf16.gmra.mxu1 %vm362_vm1, %v1946_v53 }
  0x93   : > { %1784 = vmatmul.msk.bf16.gmra.mxu3 %vm362_vm1, %v1937_v52 }
  0xa0   : > { %1709 = vmatmul.msk.bf16.gmra.mxu2 %vm362_vm1, %v1920_v54  ;;  %1829 = vmatmul.msk.bf16.gmra.mxu0 %vm362_vm1, %v1929_v55 }
  0xa1   : > { %1889 = vmatmul.msk.bf16.gmra.mxu1 %vm362_vm1, %v1947_v57 }
  0xa3   : > { %1785 = vmatmul.msk.bf16.gmra.mxu3 %vm362_vm1, %v1938_v56 }
  0xb0   : > { %1710 = vmatmul.msk.bf16.gmra.mxu2 %vm362_vm1, %v1921_v58  ;;  %1830 = vmatmul.msk.bf16.gmra.mxu0 %vm362_vm1, %v1930_v59 }
  0xb1   : > { %1890 = vmatmul.msk.bf16.gmra.mxu1 %vm362_vm1, %v1948_v61 }
  0xb3   : > { %1786 = vmatmul.msk.bf16.gmra.mxu3 %vm362_vm1, %v1939_v60 }
  0xbd   : > { %v400_v0 = vpop.f32.mrf.mxu0 }
  0xbe   : > { %v525_v3 = vpop.f32.mrf.mxu1 }
  0xbf   : > { %v2513_v4 = vadd.f32 %v525_v3, %v400_v0 }
  0xc0   : > { %1711 = vmatmul.msk.bf16.gmra.mxu2 %vm362_vm1, %v1922_v62  ;;  %1831 = vmatmul.msk.bf16.gmra.mxu0 %vm362_vm1, %v1931_v63 }
  0xc1   : > { %1891 = vmatmul.msk.bf16.gmra.mxu1 %vm362_vm1, %v1949_v2 }
  0xc3   : > { %1787 = vmatmul.msk.bf16.gmra.mxu3 %vm362_vm1, %v1940_v1  ;;  %v420_v5 = vpop.f32.mrf.mxu2  ;;  %v2585_v1 = vld [vmem:[%s2807_s2] ss:$0 sm:$0xff] }
  0xc5   : > { %v2521_v8 = vpop.f32.mrf.mxu0 }
  0xc6   : > { %v545_v6 = vpop.f32.mrf.mxu3  ;;  %v2523_v9 = vpop.f32.mrf.mxu1 }
  0xc7   : > { %v2519_v7 = vadd.f32 %v545_v6, %v420_v5  ;;  %v2590_v5 = vld [vmem:[%s2807_s2] ss:$0 sm:$0xff]  ;;  %v528_v6 = vadd.f32 %v2523_v9, %v2521_v8 }
  0xcb   : > { %v422_v10 = vpop.f32.mrf.mxu2 }
  0xcd   : > { %v405_v15 = vpop.f32.mrf.mxu0 }
  0xce   : > { %v547_v11 = vpop.f32.mrf.mxu3  ;;  %v530_v18 = vpop.f32.mrf.mxu1 }
  0xcf   : > { %v2527_v14 = vadd.f32 %v547_v11, %v422_v10  ;;  %v2531_v19 = vadd.f32 %v530_v18, %v405_v15 }
  0xd0   : > { %1712 = vmatmul.msk.bf16.gmra.mxu2 %vm362_vm1, %v1923_v12  ;;  %1832 = vmatmul.msk.bf16.gmra.mxu0 %vm362_vm1, %v1932_v13 }
  0xd1   : > { %1892 = vmatmul.msk.bf16.gmra.mxu1 %vm362_vm1, %v1950_v17 }
  0xd3   : > { %1788 = vmatmul.msk.bf16.gmra.mxu3 %vm362_vm1, %v1941_v16  ;;  %v425_v20 = vpop.f32.mrf.mxu2  ;;  %v2604_v16 = vld [vmem:[%s2808_s3] ss:$0 sm:$0xff] }
  0xd5   : > { %v2539_v23 = vpop.f32.mrf.mxu0 }
  0xd6   : > { %v550_v21 = vpop.f32.mrf.mxu3  ;;  %v2541_v24 = vpop.f32.mrf.mxu1 }
  0xd7   : > { %v2537_v22 = vadd.f32 %v550_v21, %v425_v20 }
  0xdb   : > { %v427_v25 = vpop.f32.mrf.mxu2 }
  0xdd   : > { %v410_v30 = vpop.f32.mrf.mxu0 }
  0xde   : > { %v552_v26 = vpop.f32.mrf.mxu3  ;;  %v535_v33 = vpop.f32.mrf.mxu1 }
  0xdf   : > { %v2545_v29 = vadd.f32 %v552_v26, %v427_v25  ;;  %v2549_v34 = vadd.f32 %v535_v33, %v410_v30 }
  0xe0   : > { %1713 = vmatmul.msk.bf16.gmra.mxu2 %vm362_vm1, %v1924_v27  ;;  %1833 = vmatmul.msk.bf16.gmra.mxu0 %vm362_vm1, %v1933_v28 }
  0xe1   : > { %1893 = vmatmul.msk.bf16.gmra.mxu1 %vm362_vm1, %v1951_v32 }
  0xe3   : > { %1789 = vmatmul.msk.bf16.gmra.mxu3 %vm362_vm1, %v1942_v31  ;;  %v430_v35 = vpop.f32.mrf.mxu2 }
  0xe5   : > { %v2557_v38 = vpop.f32.mrf.mxu0 }
  0xe6   : > { %v555_v36 = vpop.f32.mrf.mxu3  ;;  %v2559_v39 = vpop.f32.mrf.mxu1 }
  0xe7   : > { %v2555_v37 = vadd.f32 %v555_v36, %v430_v35 }
  0xeb   : > { %v432_v40 = vpop.f32.mrf.mxu2 }
  0xed   : > { %v415_v45 = vpop.f32.mrf.mxu0 }
  0xee   : > { %v557_v41 = vpop.f32.mrf.mxu3  ;;  %v540_v48 = vpop.f32.mrf.mxu1 }
  0xef   : > { %v2563_v44 = vadd.f32 %v557_v41, %v432_v40  ;;  %v2567_v49 = vadd.f32 %v540_v48, %v415_v45 }
  0xf0   : > { %1714 = vmatmul.msk.bf16.gmra.mxu2 %vm362_vm1, %v1925_v42  ;;  %1834 = vmatmul.msk.bf16.gmra.mxu0 %vm362_vm1, %v1934_v43 }
  0xf1   : > { %1894 = vmatmul.msk.bf16.gmra.mxu1 %vm362_vm1, %v1952_v47 }
  0xf3   : > { %1790 = vmatmul.msk.bf16.gmra.mxu3 %vm362_vm1, %v1943_v46  ;;  %v435_v50 = vpop.f32.mrf.mxu2 }
  0xf5   : > { %v2575_v53 = vpop.f32.mrf.mxu0 }
  0xf6   : > { %v560_v51 = vpop.f32.mrf.mxu3  ;;  %v2577_v54 = vpop.f32.mrf.mxu1 }
  0xf7   : > { %v2573_v52 = vadd.f32 %v560_v51, %v435_v50 }
  0xfb   : > { %v437_v55 = vpop.f32.mrf.mxu2 }
  0xfd   : > { %v1087_v58 = vpop.f32.mrf.mxu0 }
  0xfe   : > { %v562_v56 = vpop.f32.mrf.mxu3  ;;  %v1232_v59 = vpop.f32.mrf.mxu1 }
  0xff   : > { %v2579_v57 = vadd.f32 %v562_v56, %v437_v55  ;;  %v533_v56 = vadd.f32 %v2541_v24, %v2539_v23 }
 0x103   : > { %v671_v60 = vpop.f32.mrf.mxu2 }
 0x104   : > { %v711_v0 = vadd.f32 %v671_v60, %v2513_v4  ;;  %v2598_v4 = vld [vmem:[%s2808_s3] ss:$0 sm:$0xff] }
 0x105   : > { %v1089_v63 = vpop.f32.mrf.mxu0 }
 0x106   : > { %v962_v61 = vpop.f32.mrf.mxu3  ;;  %v1234_v2 = vpop.f32.mrf.mxu1  ;;  %v731_v10 = vmul.f32 %v2585_v1, %v711_v0 }
 0x107   : > { %v1088_v62 = vadd.f32 %v1087_v58, %v962_v61 }
 0x108   : > { %v751_v8 = vadd.f32 %v2598_v4, %v731_v10 }
 0x109   : > { %v1272_v3 = vadd.f32 %v1232_v59, %v1088_v62 }
 0x10a   : > { %v767_v28 = vmax.f32 %v751_v8, 0.0 }
 0x10b   : > { %v673_v11 = vpop.f32.mrf.mxu2  ;;  %v1292_v15 = vmul.f32 %v2590_v5, %v1272_v3 }
 0x10c   : > { %v712_v12 = vadd.f32 %v673_v11, %v528_v6 }
 0x10d   : > { %v1092_v18 = vpop.f32.mrf.mxu0  ;;  %v1312_v26 = vadd.f32 %v2604_v16, %v1292_v15 }
 0x10e   : > { %v964_v13 = vpop.f32.mrf.mxu3  ;;  %v732_v9 = vmul.f32 %v2585_v1, %v712_v12  ;;  %v1237_v20 = vpop.f32.mrf.mxu1 }
 0x10f   : > { %v1090_v17 = vadd.f32 %v1089_v63, %v964_v13  ;;  %v1328_v41 = vmax.f32 %v1312_v26, 0.0 }
 0x110   : > { %v752_v25 = vadd.f32 %v2598_v4, %v732_v9 }
 0x111   : > { %v1273_v21 = vadd.f32 %v1234_v2, %v1090_v17 }
 0x112   : > { %v768_v30 = vmax.f32 %v752_v25, 0.0 }
 0x113   : > { %v1293_v27 = vmul.f32 %v2590_v5, %v1273_v21  ;;  %v676_v32 = vpop.f32.mrf.mxu2 }
 0x114   : > { %v783_v33 = vadd.f32 %v768_v30, %v767_v28  ;;  %v1958_v35 = vpack.c.bf16 %v768_v30, %v767_v28  ;;  %v713_v36 = vadd.f32 %v676_v32, %v2531_v19 }
 0x115   : > { %v1313_v31 = vadd.f32 %v2604_v16, %v1293_v27  ;;  %v1094_v45 = vpop.f32.mrf.mxu0 }
 0x116   : > { %v967_v40 = vpop.f32.mrf.mxu3  ;;  %1959 = vst [vmem:[%s2614_s17] sm:$0xff] %v1958_v35   ;;  %v733_v46 = vmul.f32 %v2585_v1, %v713_v36  ;;  %v1239_v47 = vpop.f32.mrf.mxu1  ;;  %v538_v35 = vadd.f32 %v2559_v39, %v2557_v38 }
 0x117   : > { %v1329_v42 = vmax.f32 %v1313_v31, 0.0  ;;  %v1093_v43 = vadd.f32 %v1092_v18, %v967_v40 }
 0x118   : > { %v753_v55 = vadd.f32 %v2598_v4, %v733_v46 }
 0x119   : > { %v1344_v48 = vadd.f32 %v1329_v42, %v1328_v41  ;;  %v1998_v50 = vpack.c.bf16 %v1329_v42, %v1328_v41  ;;  %v1274_v51 = vadd.f32 %v1237_v20, %v1093_v43 }
 0x11a   : > { %v769_v58 = vmax.f32 %v753_v55, 0.0 }
 0x11b   : > { %2042 = vst [vmem:[%s2614_s17 + $0x40] sm:$0xff] %v1998_v50   ;;  %v1294_v19 = vmul.f32 %v2590_v5, %v1274_v51  ;;  %v678_v60 = vpop.f32.mrf.mxu2 }
 0x11c   : > { %v784_v61 = vadd.f32 %v783_v33, %v769_v58  ;;  %v714_v62 = vadd.f32 %v678_v60, %v533_v56 }
 0x11d   : > { %v1314_v59 = vadd.f32 %v2604_v16, %v1294_v19  ;;  %v1097_v3 = vpop.f32.mrf.mxu0 }
 0x11e   : > { %v969_v63 = vpop.f32.mrf.mxu3  ;;  %v734_v6 = vmul.f32 %v2585_v1, %v714_v62  ;;  %v1242_v10 = vpop.f32.mrf.mxu1 }
 0x11f   : > { %v1330_v0 = vmax.f32 %v1314_v59, 0.0  ;;  %v1095_v2 = vadd.f32 %v1094_v45, %v969_v63 }
 0x120   : > { %v754_v13 = vadd.f32 %v2598_v4, %v734_v6 }
 0x121   : > { %v1345_v11 = vadd.f32 %v1344_v48, %v1330_v0  ;;  %v1275_v12 = vadd.f32 %v1239_v47, %v1095_v2 }
 0x122   : > { %v770_v24 = vmax.f32 %v754_v13, 0.0 }
 0x123   : > { %v1295_v23 = vmul.f32 %v2590_v5, %v1275_v12  ;;  %v681_v17 = vpop.f32.mrf.mxu2  ;;  %v543_v12 = vadd.f32 %v2577_v54, %v2575_v53 }
 0x124   : > { %v785_v18 = vadd.f32 %v784_v61, %v770_v24  ;;  %v1963_v8 = vpack.c.bf16 %v770_v24, %v769_v58  ;;  %v715_v9 = vadd.f32 %v681_v17, %v2549_v34 }
 0x125   : > { %v1315_v15 = vadd.f32 %v2604_v16, %v1295_v23  ;;  %v1099_v26 = vpop.f32.mrf.mxu0 }
 0x126   : > { %v972_v20 = vpop.f32.mrf.mxu3  ;;  %2035 = vst [vmem:[%s2614_s17 + $0x8] sm:$0xff] %v1963_v8   ;;  %v735_v27 = vmul.f32 %v2585_v1, %v715_v9  ;;  %v1244_v28 = vpop.f32.mrf.mxu1 }
 0x127   : > { %v1331_v21 = vmax.f32 %v1315_v15, 0.0  ;;  %v1098_v25 = vadd.f32 %v1097_v3, %v972_v20 }
 0x128   : > { %v755_v32 = vadd.f32 %v2598_v4, %v735_v27 }
 0x129   : > { %v2631_v30 = vadd.f32 %v1345_v11, %v1331_v21  ;;  %v2003_v31 = vpack.c.bf16 %v1331_v21, %v1330_v0  ;;  %v1276_v33 = vadd.f32 %v1242_v10, %v1098_v25 }
 0x12a   : > { %v771_v36 = vmax.f32 %v755_v32, 0.0 }
 0x12b   : > { %2043 = vst [vmem:[%s2614_s17 + $0x48] sm:$0xff] %v2003_v31   ;;  %v683_v34 = vpop.f32.mrf.mxu2  ;;  %v1296_v43 = vmul.f32 %v2590_v5, %v1276_v33 }
 0x12c   : > { %v786_v40 = vadd.f32 %v785_v18, %v771_v36  ;;  %v716_v41 = vadd.f32 %v683_v34, %v538_v35 }
 0x12d   : > { %v1102_v46 = vpop.f32.mrf.mxu0  ;;  %v2641_v55 = vadd.f32 %v2604_v16, %v1296_v43 }
 0x12e   : > { %v974_v42 = vpop.f32.mrf.mxu3  ;;  %v736_v47 = vmul.f32 %v2585_v1, %v716_v41  ;;  %v1247_v48 = vpop.f32.mrf.mxu1 }
 0x12f   : > { %v1100_v45 = vadd.f32 %v1099_v26, %v974_v42  ;;  %v1332_v62 = vmax.f32 %v2641_v55, 0.0 }
 0x130   : > { %v756_v51 = vadd.f32 %v2598_v4, %v736_v47 }
 0x131   : > { %v1277_v50 = vadd.f32 %v1244_v28, %v1100_v45 }
 0x132   : > { %v772_v39 = vmax.f32 %v756_v51, 0.0 }
 0x133   : > { %v1297_v38 = vmul.f32 %v2590_v5, %v1277_v50  ;;  %v686_v56 = vpop.f32.mrf.mxu2 }
 0x134   : > { %v787_v58 = vadd.f32 %v786_v40, %v772_v39  ;;  %v1968_v59 = vpack.c.bf16 %v772_v39, %v771_v36  ;;  %v717_v60 = vadd.f32 %v686_v56, %v2567_v49 }
 0x135   : > { %v2645_v19 = vadd.f32 %v2604_v16, %v1297_v38  ;;  %v1104_v2 = vpop.f32.mrf.mxu0 }
 0x136   : > { %v977_v61 = vpop.f32.mrf.mxu3  ;;  %2036 = vst [vmem:[%s2614_s17 + $0x10] sm:$0xff] %v1968_v59   ;;  %v737_v3 = vmul.f32 %v2585_v1, %v717_v60  ;;  %v1249_v6 = vpop.f32.mrf.mxu1 }
 0x137   : > { %v1333_v63 = vmax.f32 %v2645_v19, 0.0  ;;  %v1103_v0 = vadd.f32 %v1102_v46, %v977_v61 }
 0x138   : > { %v757_v11 = vadd.f32 %v2598_v4, %v737_v3 }
 0x139   : > { %v2008_v10 = vpack.c.bf16 %v1333_v63, %v1332_v62  ;;  %v1278_v49 = vadd.f32 %v1247_v48, %v1103_v0 }
 0x13a   : > { %v773_v13 = vmax.f32 %v757_v11, 0.0 }
 0x13b   : > { %2044 = vst [vmem:[%s2614_s17 + $0x50] sm:$0xff] %v2008_v10   ;;  %v688_v23 = vpop.f32.mrf.mxu2  ;;  %v1298_v18 = vmul.f32 %v2590_v5, %v1278_v49 }
 0x13c   : > { %v788_v24 = vadd.f32 %v787_v58, %v773_v13  ;;  %v718_v15 = vadd.f32 %v688_v23, %v543_v12 }
 0x13d   : > { %v1107_v9 = vpop.f32.mrf.mxu0  ;;  %v2664_v27 = vadd.f32 %v2604_v16, %v1298_v18 }
 0x13e   : > { %v979_v17 = vpop.f32.mrf.mxu3  ;;  %v738_v20 = vmul.f32 %v2585_v1, %v718_v15  ;;  %v1252_v21 = vpop.f32.mrf.mxu1 }
 0x13f   : > { %v1105_v8 = vadd.f32 %v1104_v2, %v979_v17  ;;  %v1334_v36 = vmax.f32 %v2664_v27, 0.0 }
 0x140   : > { %v758_v26 = vadd.f32 %v2598_v4, %v738_v20 }
 0x141   : > { %v1279_v25 = vadd.f32 %v1249_v6, %v1105_v8 }
 0x142   : > { %v774_v54 = vmax.f32 %v758_v26, 0.0 }
 0x143   : > { %v1299_v53 = vmul.f32 %v2590_v5, %v1279_v25  ;;  %v691_v31 = vpop.f32.mrf.mxu2 }
 0x144   : > { %v1973_v32 = vpack.c.bf16 %v774_v54, %v773_v13  ;;  %v719_v33 = vadd.f32 %v691_v31, %v2519_v7  ;;  %v789_v47 = vadd.f32 %v788_v24, %v774_v54 }
 0x145   : > { %v2668_v28 = vadd.f32 %v2604_v16, %v1299_v53  ;;  %v1109_v41 = vpop.f32.mrf.mxu0 }
 0x146   : > { %v982_v35 = vpop.f32.mrf.mxu3  ;;  %2037 = vst [vmem:[%s2614_s17 + $0x18] sm:$0xff] %v1973_v32   ;;  %v739_v42 = vmul.f32 %v2585_v1, %v719_v33  ;;  %v1254_v43 = vpop.f32.mrf.mxu1 }
 0x147   : > { %v1335_v34 = vmax.f32 %v2668_v28, 0.0  ;;  %v1108_v40 = vadd.f32 %v1107_v9, %v982_v35 }
 0x148   : > { %v759_v46 = vadd.f32 %v2598_v4, %v739_v42 }
 0x149   : > { %v2013_v45 = vpack.c.bf16 %v1335_v34, %v1334_v36  ;;  %v1280_v7 = vadd.f32 %v1252_v21, %v1108_v40 }
 0x14a   : > { %v775_v48 = vmax.f32 %v759_v46, 0.0 }
 0x14b   : > { %2045 = vst [vmem:[%s2614_s17 + $0x58] sm:$0xff] %v2013_v45   ;;  %v693_v50 = vpop.f32.mrf.mxu2  ;;  %v1300_v56 = vmul.f32 %v2590_v5, %v1280_v7 }
 0x14c   : > { %v790_v51 = vadd.f32 %v789_v47, %v775_v48  ;;  %v720_v38 = vadd.f32 %v693_v50, %v2527_v14 }
 0x14d   : > { %v1112_v59 = vpop.f32.mrf.mxu0  ;;  %v2686_v3 = vadd.f32 %v2604_v16, %v1300_v56 }
 0x14e   : > { %v984_v39 = vpop.f32.mrf.mxu3  ;;  %v740_v60 = vmul.f32 %v2585_v1, %v720_v38  ;;  %v1257_v61 = vpop.f32.mrf.mxu1 }
 0x14f   : > { %v1110_v58 = vadd.f32 %v1109_v41, %v984_v39  ;;  %v1336_v24 = vmax.f32 %v2686_v3, 0.0 }
 0x150   : > { %v760_v2 = vadd.f32 %v2598_v4, %v740_v60 }
 0x151   : > { %v1281_v0 = vadd.f32 %v1254_v43, %v1110_v58 }
 0x152   : > { %v776_v10 = vmax.f32 %v760_v2, 0.0 }
 0x153   : > { %v1301_v6 = vmul.f32 %v2590_v5, %v1281_v0  ;;  %v696_v11 = vpop.f32.mrf.mxu2 }
 0x154   : > { %v791_v49 = vadd.f32 %v790_v51, %v776_v10  ;;  %v1978_v12 = vpack.c.bf16 %v776_v10, %v775_v48  ;;  %v721_v13 = vadd.f32 %v696_v11, %v2537_v22 }
 0x155   : > { %v2690_v14 = vadd.f32 %v2604_v16, %v1301_v6  ;;  %v1114_v18 = vpop.f32.mrf.mxu0 }
 0x156   : > { %v987_v23 = vpop.f32.mrf.mxu3  ;;  %2038 = vst [vmem:[%s2614_s17 + $0x20] sm:$0xff] %v1978_v12   ;;  %v741_v8 = vmul.f32 %v2585_v1, %v721_v13  ;;  %v1259_v9 = vpop.f32.mrf.mxu1 }
 0x157   : > { %v1337_v15 = vmax.f32 %v2690_v14, 0.0  ;;  %v1113_v17 = vadd.f32 %v1112_v59, %v987_v23 }
 0x158   : > { %v761_v21 = vadd.f32 %v2598_v4, %v741_v8 }
 0x159   : > { %v2018_v20 = vpack.c.bf16 %v1337_v15, %v1336_v24  ;;  %v1282_v22 = vadd.f32 %v1257_v61, %v1113_v17 }
 0x15a   : > { %v777_v25 = vmax.f32 %v761_v21, 0.0 }
 0x15b   : > { %2046 = vst [vmem:[%s2614_s17 + $0x60] sm:$0xff] %v2018_v20   ;;  %v698_v26 = vpop.f32.mrf.mxu2  ;;  %v1302_v32 = vmul.f32 %v2590_v5, %v1282_v22 }
 0x15c   : > { %v792_v53 = vadd.f32 %v791_v49, %v777_v25  ;;  %v722_v54 = vadd.f32 %v698_v26, %v2545_v29 }
 0x15d   : > { %v1117_v40 = vpop.f32.mrf.mxu0  ;;  %v2708_v45 = vadd.f32 %v2604_v16, %v1302_v32 }
 0x15e   : > { %v989_v31 = vpop.f32.mrf.mxu3  ;;  %v742_v35 = vmul.f32 %v2585_v1, %v722_v54  ;;  %v1262_v43 = vpop.f32.mrf.mxu1 }
 0x15f   : > { %v1115_v33 = vadd.f32 %v1114_v18, %v989_v31  ;;  %v1338_v39 = vmax.f32 %v2708_v45, 0.0 }
 0x160   : > { %v762_v42 = vadd.f32 %v2598_v4, %v742_v35 }
 0x161   : > { %v1283_v41 = vadd.f32 %v1259_v9, %v1115_v33  ;;  %v1347_v9 = vadd.f32 %v2631_v30, %v1332_v62 }
 0x162   : > { %v778_v7 = vmax.f32 %v762_v42, 0.0 }
 0x163   : > { %v1303_v46 = vmul.f32 %v2590_v5, %v1283_v41  ;;  %v701_v47 = vpop.f32.mrf.mxu2 }
 0x164   : > { %v793_v48 = vadd.f32 %v792_v53, %v778_v7  ;;  %v1983_v50 = vpack.c.bf16 %v778_v7, %v777_v25  ;;  %v723_v51 = vadd.f32 %v701_v47, %v2555_v37  ;;  %v1348_v25 = vadd.f32 %v1347_v9, %v1333_v63 }
 0x165   : > { %v2712_v29 = vadd.f32 %v2604_v16, %v1303_v46  ;;  %v1119_v0 = vpop.f32.mrf.mxu0 }
 0x166   : > { %v992_v38 = vpop.f32.mrf.mxu3  ;;  %2039 = vst [vmem:[%s2614_s17 + $0x28] sm:$0xff] %v1983_v50   ;;  %v743_v59 = vmul.f32 %v2585_v1, %v723_v51  ;;  %v1264_v10 = vpop.f32.mrf.mxu1  ;;  %v1349_v62 = vadd.f32 %v1348_v25, %v1334_v36 }
 0x167   : > { %v1339_v56 = vmax.f32 %v2712_v29, 0.0  ;;  %v1118_v58 = vadd.f32 %v1117_v40, %v992_v38 }
 0x168   : > { %v763_v61 = vadd.f32 %v2598_v4, %v743_v59  ;;  %v1350_v63 = vadd.f32 %v1349_v62, %v1335_v34 }
 0x169   : > { %v2023_v60 = vpack.c.bf16 %v1339_v56, %v1338_v39  ;;  %v1284_v2 = vadd.f32 %v1262_v43, %v1118_v58 }
 0x16a   : > { %v779_v6 = vmax.f32 %v763_v61, 0.0 }
 0x16b   : > { %2047 = vst [vmem:[%s2614_s17 + $0x68] sm:$0xff] %v2023_v60   ;;  %v703_v11 = vpop.f32.mrf.mxu2  ;;  %v1304_v13 = vmul.f32 %v2590_v5, %v1284_v2 }
 0x16c   : > { %v794_v49 = vadd.f32 %v793_v48, %v779_v6  ;;  %v724_v37 = vadd.f32 %v703_v11, %v2563_v44 }
 0x16d   : > { %v1324_v20 = vadd.f32 %v2604_v16, %v1304_v13  ;;  %v1122_v44 = vpop.f32.mrf.mxu0 }
 0x16e   : > { %v994_v12 = vpop.f32.mrf.mxu3  ;;  %v744_v17 = vmul.f32 %v2585_v1, %v724_v37  ;;  %v1267_v32 = vpop.f32.mrf.mxu1 }
 0x16f   : > { %v1120_v23 = vadd.f32 %v1119_v0, %v994_v12  ;;  %v1340_v33 = vmax.f32 %v1324_v20, 0.0 }
 0x170   : > { %v764_v8 = vadd.f32 %v2598_v4, %v744_v17 }
 0x171   : > { %v1285_v18 = vadd.f32 %v1264_v10, %v1120_v23 }
 0x172   : > { %v780_v22 = vmax.f32 %v764_v8, 0.0 }
 0x173   : > { %v1305_v21 = vmul.f32 %v2590_v5, %v1285_v18  ;;  %v706_v53 = vpop.f32.mrf.mxu2 }
 0x174   : > { %v795_v54 = vadd.f32 %v794_v49, %v780_v22  ;;  %v1988_v31 = vpack.c.bf16 %v780_v22, %v779_v6  ;;  %v725_v55 = vadd.f32 %v706_v53, %v2573_v52  ;;  %v1351_v52 = vadd.f32 %v1350_v63, %v1336_v24 }
 0x175   : > { %v1325_v26 = vadd.f32 %v2604_v16, %v1305_v21  ;;  %v1124_v29 = vpop.f32.mrf.mxu0 }
 0x176   : > { %v997_v30 = vpop.f32.mrf.mxu3  ;;  %2040 = vst [vmem:[%s2614_s17 + $0x30] sm:$0xff] %v1988_v31   ;;  %v745_v19 = vmul.f32 %v2585_v1, %v725_v55  ;;  %v1352_v45 = vadd.f32 %v1351_v52, %v1337_v15  ;;  %v1269_v3 = vpop.f32.mrf.mxu1 }
 0x177   : > { %v1341_v35 = vmax.f32 %v1325_v26, 0.0  ;;  %v1123_v40 = vadd.f32 %v1122_v44, %v997_v30 }
 0x178   : > { %v765_v43 = vadd.f32 %v2598_v4, %v745_v19  ;;  %v1353_v47 = vadd.f32 %v1352_v45, %v1338_v39 }
 0x179   : > { %v2028_v41 = vpack.c.bf16 %v1341_v35, %v1340_v33  ;;  %v1286_v42 = vadd.f32 %v1267_v32, %v1123_v40 }
 0x17a   : > { %v781_v36 = vmax.f32 %v765_v43, 0.0  ;;  %v1354_v51 = vadd.f32 %v1353_v47, %v1339_v56 }
 0x17b   : > { %2048 = vst [vmem:[%s2614_s17 + $0x70] sm:$0xff] %v2028_v41   ;;  %v1306_v27 = vmul.f32 %v2590_v5, %v1286_v42  ;;  %v708_v46 = vpop.f32.mrf.mxu2 }
 0x17c   : > { %v796_v7 = vadd.f32 %v795_v54, %v781_v36  ;;  %v726_v28 = vadd.f32 %v708_v46, %v2579_v57  ;;  %v1355_v57 = vadd.f32 %v1354_v51, %v1340_v33 }
 0x17d   : > { %v1326_v48 = vadd.f32 %v2604_v16, %v1306_v27 }
 0x17e   : > { %v999_v34 = vpop.f32.mrf.mxu3  ;;  %v746_v24 = vmul.f32 %v2585_v1, %v726_v28  ;;  %v1356_v59 = vadd.f32 %v1355_v57, %v1341_v35 }
 0x17f   : > { %v1125_v50 = vadd.f32 %v1124_v29, %v999_v34  ;;  %v1342_v15 = vmax.f32 %v1326_v48, 0.0 }
 0x180   : > { %v766_v14 = vadd.f32 %v2598_v4, %v746_v24 }
 0x181   : > { %v1287_v38 = vadd.f32 %v1269_v3, %v1125_v50  ;;  %v1357_v61 = vadd.f32 %v1356_v59, %v1342_v15 }
 0x182   : > { %v782_v58 = vmax.f32 %v766_v14, 0.0 }
 0x183   : > { %v1307_v39 = vmul.f32 %v2590_v5, %v1287_v38 }
 0x184   : > { %v797_v1 = vadd.f32 %v796_v7, %v782_v58  ;;  %v1993_v56 = vpack.c.bf16 %v782_v58, %v781_v36 }
 0x185   : > { %v1327_v60 = vadd.f32 %v2604_v16, %v1307_v39 }
 0x186   : > { %v798_v0 = vrot.slane %v797_v1, 4  ;;  %2041 = vst [vmem:[%s2614_s17 + $0x38] sm:$0xff] %v1993_v56  }
 0x187   : > { %v1343_v4 = vmax.f32 %v1327_v60, 0.0 }
 0x188   : > { %v799_v5 = vadd.f32 %v798_v0, %v797_v1 }
 0x189   : > { %v1358_v2 = vadd.f32 %v1357_v61, %v1343_v4  ;;  %v2033_v6 = vpack.c.bf16 %v1343_v4, %v1342_v15 }
 0x18a   : > { %v800_v11 = vrot.slane %v799_v5, 2 }
 0x18b   : > { %v1359_v10 = vrot.slane %v1358_v2, 4  ;;  %2049 = vst [vmem:[%s2614_s17 + $0x78] sm:$0xff] %v2033_v6  }
 0x18c   : > { %2214 = shalt.err (!%p2211_p10)
}
 0x18d   : > { %s2294_s15 = smov 64   ;;  %s2295_s17 = smov 4   ;;  %v1360_v16 = vadd.f32 %v1359_v10, %v1358_v2  ;;  %v801_v49 = vadd.f32 %v800_v11, %v799_v5 }
 0x18e   : > { %2063 = dma.vmem_to_hbm [thread:$0]  (%p2396_p7), %s1417_s8, 2048, %s1419_s9, %s1400_s24, %s2294_s15, %s2294_s15, %s2295_s17  }
 0x18f   : > { %v1361_v37 = vrot.slane %v1360_v16, 2  ;;  %v802_v12 = vrot.slane %v801_v49, 1  ;;  %s1430_s16 = scalar_lea.hbm %s2810_s5, %s2347_s22  ;;  %s271_s1 = scalar_lea.vmem [#allocation8], %s2425_s26 }
 0x190   : > { %s1432_s29 = sshll.u32 %s271_s1, 4  ;;  %s1434_s27 = sshll.u32 %s1430_s16, 4  ;;  %s1433_s29 = int_to_ptr.vmem [resolvable:$true] %s1432_s29  ;;  %s1435_s27 = int_to_ptr.hbm [resolvable:$true] %s1434_s27 }
 0x191   : > { %v1362_v13 = vadd.f32 %v1361_v37, %v1360_v16  ;;  %v803_v17 = vadd.f32 %v802_v12, %v801_v49  ;;  %s1405_s8 = scalar_lea.sflag [#allocation9], %s2425_s26  ;;  %s2229_s9 = sshra.s32 %s1435_s27, 4  ;;  %s2230_s9 = int_to_ptr.hbm [resolvable:$true] %s2229_s9 }
 0x192   : > { %s2231_s24 = scalar_lea.hbm %s2230_s9, 1  ;;  %s2235_s30 = scalar_lea.hbm %s2810_s5, 2 }
 0x193   : > { %v1363_v23 = vrot.slane %v1362_v13, 1  ;;  %p2232_p12 = scmp.ne.s32.totalorder %s2230_s9, %s2231_s24  ;;  %p2236_p3 = scmp.lt.s32.totalorder %s2230_s9, %s2810_s5 }
 0x194   : > { %p2237_p5 = scmp.lt.s32.totalorder %s2235_s30, %s2231_s24 }
 0x195   : > { %v1364_v18 = vadd.f32 %v1363_v23, %v1362_v13  ;;  %p2233_p13 = pnand %p2232_p12, %p2396_p7 }
 0x196   : > { %p2238_p1 = por %p2237_p5, %p2236_p3 }
 0x197   : > { %v1365_v8 = vadd.f32 %v1364_v18, %v803_v17  ;;  %p2234_p0 = pneg %p2233_p13 }
 0x199   : > { %1398 = vst [vmem:[%s271_s1] sm:$0x1] %v1365_v8  ;;  %p2239_p4 = pnand %p2238_p1, %p2234_p0 }
 0x19b   : > { %2242 = shalt.err (!%p2239_p4)
}
 0x19c   : > { %2064 = dma.vmem_to_hbm [thread:$0]  (%p2396_p7), %s1433_s29, 16, %s1435_s27, %s1405_s8  }
 0x19d PF: > { %s1446_s26 = sand.u32 1, %s2277_s18   ;;  %p2822_p8 = scmp.ge.s32.totalorder %s2289_s21, 2 }
 0x19e   : > { %s1447_s11 = scalar_lea.sflag [#allocation4], %s1446_s26 }
 0x19f   : > { %p2076_p11 = pnand %p2822_p8, %p2361_p6 }
 0x1a1   : > { %p2077_p9 = pneg %p2076_p11 }
 0x1a3   : > { %2268 = dma.done.wait (%p2077_p9), %s1447_s11, 2048  }
 0x1a4   : > { %2270 = vsyncadd (%p2077_p9), %s1447_s11, 4294965248  ;;  %s1457_s15 = scalar_lea.sflag [#allocation9], %s1446_s26 }
 0x1a5   : > { %2272 = dma.done.wait (%p2077_p9), %s1457_s15, 16  }
 0x1a6   : > { %2274 = vsyncadd (%p2077_p9), %s1457_s15, 4294967280  ;;  %p23_p7 = scmp.ge.s32.totalorder %s2379_s7, 4   ;;  %s2823_s18 = smov %s2281_s19 }
 0x1a7   : > { %s2824_s19 = smov %s2285_s20  ;;  %s2825_s20 = smov %s2392_s12 }
 0x1a8   : > { %s2826_s21 = smov %s2379_s7  ;;  %25 = sbr.rel (!%p23_p7) target bundleno = 10 (0xa), region = 109 }
 0x1ad   :  { %1462 = vsyncpa [#allocation3], 1 }
 0x1ae   :  { %1464 = vsyncpa [#allocation3 + $0x1], 1 }
 0x1af   :  { %1465 = vsyncpa [#allocation6], 1 }
 0x1b0   :  { %1466 = vsyncpa [#allocation4], 1 }
 0x1b1   :  { %1468 = vsyncpa [#allocation4 + $0x1], 1 }
 0x1b2   :  { %1469 = vsyncpa [#allocation9], 1 }
 0x1b3   :  { %1471 = vsyncpa [#allocation9 + $0x1], 1 }

</bundles_post_ra>
